<compile_context>
chip_gen: v7x
topology: tpu7x:2x2x1
jax: 0.10.0
libtpu: 0.0.40
codegen_flags: <defaults>
</compile_context>

<pallas_src>
import functools

import jax
import jax.numpy as jnp
from jax import lax
from jax.experimental import pallas as pl
from jax.experimental.pallas import tpu as pltpu


# --------------------------------------------------------------------------
# Kernel bodies
# --------------------------------------------------------------------------
def _eirnn_cell_kernel(*refs, alpha, has_recurrent):
    """One EIRnnModule.forward() step on one E-tile (weights pre-rectified)."""
    if has_recurrent:
        (w_rec_ref, w_in_ref, w_out_ref, inp_ref, st_ref,
         new_st_ref, out_ref) = refs
    else:
        (w_in_ref, w_out_ref, inp_ref, st_ref, new_st_ref, out_ref) = refs

    states = st_ref[...]
    update = jnp.dot(w_in_ref[...], inp_ref[...],
                     preferred_element_type=jnp.float32)
    if has_recurrent:
        update = update + jnp.dot(w_rec_ref[...], jnp.maximum(states, 0.0),
                                  preferred_element_type=jnp.float32)
    new_states = (1.0 - alpha) * states + alpha * update
    outputs = jnp.dot(w_out_ref[...], jnp.maximum(new_states, 0.0),
                      preferred_element_type=jnp.float32)
    new_st_ref[...] = new_states.astype(new_st_ref.dtype)
    out_ref[...] = outputs.astype(out_ref.dtype)


def _eirnn_multistep_kernel(*refs, alpha, has_recurrent, t_blk):
    """Fused time loop: grid = (E_tiles, T // t_blk).

    Weights are VMEM-resident (constant index_maps).  The running state is
    carried in a VMEM scratch across time blocks and in registers inside the
    unrolled t_blk loop.  All weight rectification / Dale scaling was hoisted
    into the wrapper, so the per-step work is just 2-3 small MXU dots + VPU.
    """
    if has_recurrent:
        (w_rec_ref, w_in_ref, w_out_ref, inp_ref, st0_ref,
         outs_ref, stT_ref, state_sc) = refs
    else:
        (w_in_ref, w_out_ref, inp_ref, st0_ref,
         outs_ref, stT_ref, state_sc) = refs

    tb = pl.program_id(1)

    @pl.when(tb == 0)
    def _():
        state_sc[...] = st0_ref[...]

    w_in = w_in_ref[...]
    w_out = w_out_ref[...]
    w_rec = w_rec_ref[...] if has_recurrent else None

    def step(t, states):
        update = jnp.dot(w_in, inp_ref[t], preferred_element_type=jnp.float32)
        if has_recurrent:
            update = update + jnp.dot(w_rec, jnp.maximum(states, 0.0),
                                      preferred_element_type=jnp.float32)
        new_states = (1.0 - alpha) * states + alpha * update
        outs_ref[t] = jnp.dot(w_out, jnp.maximum(new_states, 0.0),
                              preferred_element_type=jnp.float32
                              ).astype(outs_ref.dtype)
        return new_states

    states = lax.fori_loop(0, t_blk, step, state_sc[...], unroll=True)
    state_sc[...] = states

    @pl.when(tb == pl.num_programs(1) - 1)
    def _():
        stT_ref[...] = states.astype(stT_ref.dtype)


# --------------------------------------------------------------------------
# Wrappers
# --------------------------------------------------------------------------
def _pick_e_tile(E, e_tile, cap=1024):
    # On v7x prefer an e_tile giving n_e % 2 == 0 so both TensorCores engage;
    # pass e_tile explicitly there.  Default: biggest lane-dense tile <= cap.
    if e_tile is None:
        if E <= cap:
            e_tile = E
        else:
            e_tile = None
            for cand in range(cap, 0, -128):
                if E % cand == 0:
                    e_tile = cand
                    break
            if e_tile is None:
                e_tile = E
    assert E % e_tile == 0 and (e_tile == E or e_tile % 128 == 0), (
        "embedding_dim must be tileable into lane-dense (multiple-of-128) tiles")
    return e_tile


def _pick_t_blk(T, t_blk, cap=8):
    if t_blk is None:
        t_blk = min(T, cap)
    t_blk = max(1, min(int(t_blk), T))
    while T % t_blk != 0:
        t_blk -= 1
    return t_blk


def _prep_weights(w_in, w_rec, d_diag, w_out, no_self_connect, has_recurrent,
                  stream_dtype=jnp.float32):
    """Hoist all per-step weight prep out of the kernels.

    relu() is idempotent (weights are rectified in __init__ and re-rectified
    every forward()), and w_rec @ diag(d) == w_rec * d[None, :] exactly, so
    precomputing here is numerically identical to the in-kernel version.
    """
    w_in_eff = jnp.maximum(w_in, 0.0).astype(stream_dtype)
    w_out_eff = jnp.maximum(w_out, 0.0).astype(jnp.float32)
    if not has_recurrent:
        # Recurrent path statically zeroed: w_rec / d_rec are never DMA'd.
        return (w_in_eff, w_out_eff)
    w_rec_eff = (jnp.maximum(w_rec, 0.0).astype(jnp.float32)
                 * jnp.float32(no_self_connect)
                 * d_diag.astype(jnp.float32)[None, :])
    return (w_rec_eff, w_in_eff, w_out_eff)


def eirnn_cell_forward(w_in, w_rec, d_diag, w_out, input_, states, *,
                       alpha, no_self_connect, e_tile=None):
    """One EIRnnModule.forward() step.  Returns (new_states, outputs).

    NOTE: prefer eirnn_multistep_forward for the EIRnn time loop — every
    single-step call re-DMAs the full weight set from HBM, while the fused
    loop keeps the weights VMEM-resident for all T steps.
    """
    H, E = states.shape
    I = w_in.shape[1]
    N_OUT = w_out.shape[0]
    has_recurrent = float(no_self_connect) != 0.0
    e_tile = _pick_e_tile(E, e_tile)
    n_e = E // e_tile

    weights = _prep_weights(w_in, w_rec, d_diag, w_out, no_self_connect,
                            has_recurrent)
    weight_specs = [pl.BlockSpec(w.shape, lambda e: (0, 0)) for w in weights]

    in_specs = weight_specs + [
        pl.BlockSpec((I, e_tile), lambda e: (0, e)),
        pl.BlockSpec((H, e_tile), lambda e: (0, e)),
    ]
    out_specs = (
        pl.BlockSpec((H, e_tile), lambda e: (0, e)),
        pl.BlockSpec((N_OUT, e_tile), lambda e: (0, e)),
    )

    flops = (2 * H * (H * int(has_recurrent) + I) + 2 * N_OUT * H) * E
    bytes_accessed = (sum(int(w.size) * w.dtype.itemsize for w in weights)
                      + 4 * (int(input_.size) + 2 * int(states.size)
                             + N_OUT * E))

    kernel = functools.partial(_eirnn_cell_kernel, alpha=float(alpha),
                               has_recurrent=has_recurrent)
    return pl.pallas_call(
        kernel,
        out_shape=(jax.ShapeDtypeStruct((H, E), jnp.float32),
                   jax.ShapeDtypeStruct((N_OUT, E), jnp.float32)),
        grid=(n_e,),
        in_specs=in_specs,
        out_specs=out_specs,
        compiler_params=pltpu.CompilerParams(dimension_semantics=("parallel",)),
        cost_estimate=pl.CostEstimate(flops=int(flops), transcendentals=0,
                                      bytes_accessed=int(bytes_accessed)),
    )(*weights, input_, states)


def eirnn_multistep_forward(w_in, w_rec, d_diag, w_out, inputs_t, states_init,
                            *, alpha, no_self_connect, e_tile=None, t_blk=None,
                            stream_dtype=jnp.float32):
    """EIRnn's inner time loop (one layer) fused into a single pallas_call.

    inputs_t: (T, input_units, embedding_dim) per-step inputs.
    Returns (outputs_t: (T, output_units, E), states_final: (H, E)).

    stream_dtype: dtype for the streamed inputs_t (and w_in) — bf16 halves the
    dominant HBM traffic; the state carry and all accumulation stay f32.
    """
    T, I, E = inputs_t.shape
    H = states_init.shape[0]
    N_OUT = w_out.shape[0]
    has_recurrent = float(no_self_connect) != 0.0
    e_tile = _pick_e_tile(E, e_tile)
    n_e = E // e_tile
    t_blk = _pick_t_blk(T, t_blk)
    n_tb = T // t_blk

    weights = _prep_weights(w_in, w_rec, d_diag, w_out, no_self_connect,
                            has_recurrent, stream_dtype=stream_dtype)
    inputs_t = inputs_t.astype(stream_dtype)

    weight_specs = [pl.BlockSpec(w.shape, lambda e, tb: (0, 0))
                    for w in weights]

    in_specs = weight_specs + [
        pl.BlockSpec((t_blk, I, e_tile), lambda e, tb: (tb, 0, e)),
        pl.BlockSpec((H, e_tile), lambda e, tb: (0, e)),
    ]
    out_specs = (
        pl.BlockSpec((t_blk, N_OUT, e_tile), lambda e, tb: (tb, 0, e)),
        pl.BlockSpec((H, e_tile), lambda e, tb: (0, e)),
    )

    # Rooflines / VMEM budget.
    flops = (2 * H * (H * int(has_recurrent) + I) + 2 * N_OUT * H) * E * T
    weight_bytes = sum(int(w.size) * w.dtype.itemsize for w in weights)
    stream_in_bytes = int(inputs_t.size) * jnp.dtype(stream_dtype).itemsize
    bytes_accessed = (weight_bytes + stream_in_bytes
                      + 4 * (2 * int(states_init.size) + T * N_OUT * E))

    blk_in = t_blk * I * e_tile * jnp.dtype(stream_dtype).itemsize
    blk_out = t_blk * N_OUT * e_tile * 4
    blk_st = H * e_tile * 4
    vmem_est = 2 * weight_bytes + 2 * blk_in + 2 * blk_out + 4 * blk_st + blk_st
    vmem_limit = None
    if vmem_est * 2 > (16 << 20):   # exceeds v5e's default scoped VMEM limit
        vmem_limit = min(int(vmem_est * 2) + (2 << 20), 64 << 20)

    kernel = functools.partial(_eirnn_multistep_kernel, alpha=float(alpha),
                               has_recurrent=has_recurrent, t_blk=t_blk)
    return pl.pallas_call(
        kernel,
        out_shape=(jax.ShapeDtypeStruct((T, N_OUT, E), jnp.float32),
                   jax.ShapeDtypeStruct((H, E), jnp.float32)),
        grid=(n_e, n_tb),
        in_specs=in_specs,
        out_specs=out_specs,
        scratch_shapes=[pltpu.VMEM((H, e_tile), jnp.float32)],
        compiler_params=pltpu.CompilerParams(
            dimension_semantics=("parallel", "arbitrary"),
            vmem_limit_bytes=vmem_limit),
        cost_estimate=pl.CostEstimate(flops=int(flops), transcendentals=0,
                                      bytes_accessed=int(bytes_accessed)),
    )(*weights, inputs_t, states_init)


# --------------------------------------------------------------------------
# Pure-JAX reference (literal transcription of EIRnnModule.forward)
# --------------------------------------------------------------------------
def eirnn_cell_reference(w_in, w_rec, d_rec, w_out, input_, states, *,
                         alpha, no_self_connect):
    w_in = jnp.maximum(w_in, 0.0)
    w_rec = jnp.maximum(w_rec, 0.0) * no_self_connect
    w_out = jnp.maximum(w_out, 0.0)
    rect_states = jnp.maximum(states, 0.0)
    w_rec_dale = w_rec @ d_rec
    hidden_update = w_rec_dale @ rect_states
    input_update = w_in @ input_
    new_states = (1.0 - alpha) * states + alpha * (hidden_update + input_update)
    outputs = w_out @ jnp.maximum(new_states, 0.0)
    return new_states, outputs


# --------------------------------------------------------------------------
# Demo / self-test
# --------------------------------------------------------------------------
if __name__ == "__main__":
    hidden_units = 32
    input_units = 16
    output_units = 8
    embedding_dim = 128
    max_time = 6

    dt, tau = 0.5, 100.0
    alpha = dt / tau

    key = jax.random.PRNGKey(0)
    k_in, k_rec, k_out, k_x, k_s, k_xt = jax.random.split(key, 6)

    # __init__: weights are relu(randn(...))
    w_in = jnp.maximum(jax.random.normal(k_in, (hidden_units, input_units),
                                         dtype=jnp.float32), 0.0)
    w_rec = jnp.maximum(jax.random.normal(k_rec, (hidden_units, hidden_units),
                                          dtype=jnp.float32), 0.0)
    w_out = jnp.maximum(jax.random.normal(k_out, (output_units, hidden_units),
                                          dtype=jnp.float32), 0.0)

    # Dale diagonal: +1 for first 80% of units (excitatory), -1 for the rest.
    d_diag = jnp.where(jnp.arange(hidden_units) < 0.8 * hidden_units,
                       1.0, -1.0).astype(jnp.float32)
    d_rec = jnp.diag(d_diag)      # dense matrix only used by the reference

    input_ = jax.random.normal(k_x, (input_units, embedding_dim), jnp.float32)
    states = jax.random.normal(k_s, (hidden_units, embedding_dim), jnp.float32)
    # Per-step inputs for the fused time loop (EIRnn feeds embed(x) at t=0 and
    # embed(zero token) afterwards; deterministic random stand-ins here).
    inputs_t = jax.random.normal(k_xt, (max_time, input_units, embedding_dim),
                                 jnp.float32)

    # no_self_connect = 0.0 is the module's actual (buggy) value; 1.0 also
    # exercises the full recurrent / Dale path of the kernel.
    for nsc in (0.0, 1.0):
        # --- single step ---
        new_states, outputs = eirnn_cell_forward(
            w_in, w_rec, d_diag, w_out, input_, states,
            alpha=alpha, no_self_connect=nsc)
        jax.block_until_ready((new_states, outputs))
        ref_states, ref_outputs = eirnn_cell_reference(
            w_in, w_rec, d_rec, w_out, input_, states,
            alpha=alpha, no_self_connect=nsc)
        assert new_states.shape == (hidden_units, embedding_dim)
        assert outputs.shape == (output_units, embedding_dim)
        assert jnp.allclose(new_states, ref_states, atol=1e-4, rtol=1e-4)
        assert jnp.allclose(outputs, ref_outputs, atol=1e-4, rtol=1e-4)

        # --- fused time loop (time-blocked) ---
        outs_t, state_T = eirnn_multistep_forward(
            w_in, w_rec, d_diag, w_out, inputs_t, states,
            alpha=alpha, no_self_connect=nsc)
        jax.block_until_ready((outs_t, state_T))
        assert outs_t.shape == (max_time, output_units, embedding_dim)
        assert state_T.shape == (hidden_units, embedding_dim)
        st = states
        ref_outs = []
        for t in range(max_time):
            st, o = eirnn_cell_reference(
                w_in, w_rec, d_rec, w_out, inputs_t[t], st,
                alpha=alpha, no_self_connect=nsc)
            ref_outs.append(o)
            assert jnp.allclose(outs_t[t], o, atol=1e-4, rtol=1e-4)
        assert jnp.allclose(state_T, st, atol=1e-4, rtol=1e-4)

        # --- bf16-streamed variant (loose tolerance vs the f32 reference) ---
        outs_bf, state_bf = eirnn_multistep_forward(
            w_in, w_rec, d_diag, w_out, inputs_t, states,
            alpha=alpha, no_self_connect=nsc, stream_dtype=jnp.bfloat16)
        jax.block_until_ready((outs_bf, state_bf))
        assert jnp.allclose(state_bf, st, atol=1e-1, rtol=5e-2)
        for t in range(max_time):
            assert jnp.allclose(outs_bf[t], ref_outs[t], atol=1e-1, rtol=5e-2)

    print("KERNEL_OK")
</pallas_src>

<mosaic_0001>
module attributes {stable_mosaic.version = 11 : i64} {
  func.func @_eirnn_cell_kernel(%arg0: i32, %arg1: memref<32x16xf32, #tpu.memory_space<vmem>>, %arg2: memref<8x32xf32, #tpu.memory_space<vmem>>, %arg3: memref<16x128xf32, #tpu.memory_space<vmem>>, %arg4: memref<32x128xf32, #tpu.memory_space<vmem>>, %arg5: memref<32x128xf32, #tpu.memory_space<vmem>>, %arg6: memref<8x128xf32, #tpu.memory_space<vmem>>) attributes {dimension_semantics = [#tpu.dimension_semantics<parallel>], iteration_bounds = array<i64: 1>, scalar_prefetch = 0 : i64, scratch_operands = 0 : i64, tpu.core_type = #tpu.core_type<tc>, window_params = [{pipeline_mode = #tpu.pipeline_mode<synchronous>, transform_indices = @transform_0, window_bounds = array<i64: 32, 16>}, {pipeline_mode = #tpu.pipeline_mode<synchronous>, transform_indices = @transform_1, window_bounds = array<i64: 8, 32>}, {transform_indices = @transform_2, window_bounds = array<i64: 16, 128>}, {transform_indices = @transform_3, window_bounds = array<i64: 32, 128>}, {transform_indices = @transform_4, window_bounds = array<i64: 32, 128>}, {transform_indices = @transform_5, window_bounds = array<i64: 8, 128>}]} {
    %c0 = arith.constant 0 : index
    %c0_0 = arith.constant 0 : index
    %0 = vector.load %arg4[%c0, %c0_0] : memref<32x128xf32, #tpu.memory_space<vmem>>, vector<32x128xf32>
    %c0_1 = arith.constant 0 : index
    %c0_2 = arith.constant 0 : index
    %1 = vector.load %arg1[%c0_1, %c0_2] : memref<32x16xf32, #tpu.memory_space<vmem>>, vector<32x16xf32>
    %c0_3 = arith.constant 0 : index
    %c0_4 = arith.constant 0 : index
    %2 = vector.load %arg3[%c0_3, %c0_4] : memref<16x128xf32, #tpu.memory_space<vmem>>, vector<16x128xf32>
    %cst = arith.constant dense<0.000000e+00> : vector<32x128xf32>
    %3 = tpu.matmul %1, %2, %cst {dimension_numbers = #tpu.dot_dimension_numbers<[1], [0], [0], [1], [0, 0, 1, 1], [], []>} : vector<32x16xf32>, vector<16x128xf32>, vector<32x128xf32> -> vector<32x128xf32>
    %cst_5 = arith.constant 9.950000e-01 : f32
    %4 = vector.broadcast %cst_5 : f32 to vector<32x128xf32>
    %5 = arith.mulf %4, %0 : vector<32x128xf32>
    %cst_6 = arith.constant 5.000000e-03 : f32
    %6 = vector.broadcast %cst_6 : f32 to vector<32x128xf32>
    %7 = arith.mulf %6, %3 : vector<32x128xf32>
    %8 = arith.addf %5, %7 : vector<32x128xf32>
    %c0_7 = arith.constant 0 : index
    %c0_8 = arith.constant 0 : index
    %9 = vector.load %arg2[%c0_7, %c0_8] : memref<8x32xf32, #tpu.memory_space<vmem>>, vector<8x32xf32>
    %cst_9 = arith.constant 0.000000e+00 : f32
    %10 = vector.broadcast %cst_9 : f32 to vector<32x128xf32>
    %11 = arith.maximumf %8, %10 : vector<32x128xf32>
    %cst_10 = arith.constant dense<0.000000e+00> : vector<8x128xf32>
    %12 = tpu.matmul %9, %11, %cst_10 {dimension_numbers = #tpu.dot_dimension_numbers<[1], [0], [0], [1], [0, 0, 1, 1], [], []>} : vector<8x32xf32>, vector<32x128xf32>, vector<8x128xf32> -> vector<8x128xf32>
    %c0_11 = arith.constant 0 : index
    %c0_12 = arith.constant 0 : index
    %13 = vector.load %arg5[%c0_11, %c0_12] : memref<32x128xf32, #tpu.memory_space<vmem>>, vector<32x128xf32>
    tpu.vector_store %arg5[%c0_11, %c0_12], %8 {strides = array<i32>} : memref<32x128xf32, #tpu.memory_space<vmem>>, vector<32x128xf32>,
    %c0_13 = arith.constant 0 : index
    %c0_14 = arith.constant 0 : index
    %14 = vector.load %arg6[%c0_13, %c0_14] : memref<8x128xf32, #tpu.memory_space<vmem>>, vector<8x128xf32>
    tpu.vector_store %arg6[%c0_13, %c0_14], %12 {strides = array<i32>} : memref<8x128xf32, #tpu.memory_space<vmem>>, vector<8x128xf32>,
    return
  }
  func.func @transform_0(%arg0: i32) -> (i32, i32) {
    %c0_i32 = arith.constant 0 : i32
    %c0_i32_0 = arith.constant 0 : i32
    %c0_i32_1 = arith.constant 0 : i32
    return %c0_i32, %c0_i32_0 : i32, i32
  }
  func.func @transform_1(%arg0: i32) -> (i32, i32) {
    %c0_i32 = arith.constant 0 : i32
    %c0_i32_0 = arith.constant 0 : i32
    %c0_i32_1 = arith.constant 0 : i32
    return %c0_i32, %c0_i32_0 : i32, i32
  }
  func.func @transform_2(%arg0: i32) -> (i32, i32) {
    %c0_i32 = arith.constant 0 : i32
    %c0_i32_0 = arith.constant 0 : i32
    return %c0_i32, %arg0 : i32, i32
  }
  func.func @transform_3(%arg0: i32) -> (i32, i32) {
    %c0_i32 = arith.constant 0 : i32
    %c0_i32_0 = arith.constant 0 : i32
    return %c0_i32, %arg0 : i32, i32
  }
  func.func @transform_4(%arg0: i32) -> (i32, i32) {
    %c0_i32 = arith.constant 0 : i32
    %c0_i32_0 = arith.constant 0 : i32
    return %c0_i32, %arg0 : i32, i32
  }
  func.func @transform_5(%arg0: i32) -> (i32, i32) {
    %c0_i32 = arith.constant 0 : i32
    %c0_i32_0 = arith.constant 0 : i32
    return %c0_i32, %arg0 : i32, i32
  }
}

</mosaic_0001>

<bundles_post_ra>
// kernel: tpu_custom_call.1
= control target key start
LH: loop header
LB: loop body
LE: loop exit
PB: predicated region body
PF: predicated region fallthrough
CT: control target
= control target key end

     0   :  { %11 = vsyncpa [#allocation3], 0  ;;  %vm31_vm0 = vcmask 130048   ;;  %s451_s0 = inlined_call_operand.vmem [shape: f32[32,16], index: 0, kind: input, shape index: {}]   ;;  %s452_s1 = inlined_call_operand.vmem [shape: f32[8,32], index: 1, kind: input, shape index: {}]   ;;  %s453_s2 = inlined_call_operand.vmem [shape: f32[16,128], index: 2, kind: input, shape index: {}]   ;;  %s454_s3 = inlined_call_operand.vmem [shape: f32[32,128], index: 3, kind: input, shape index: {}]   ;;  %s455_s4 = inlined_call_operand.hbm [shape: f32[32,128], index: 4, kind: output, shape index: {0}]   ;;  %s456_s5 = inlined_call_operand.hbm [shape: f32[8,128], index: 5, kind: output, shape index: {1}]  }
   0x1   :  { %v29_v0 = vld [vmem:[%s453_s2] sm:$0xff]  ;;  %v30_v1 = vld [vmem:[%s453_s2 + $0x8] sm:$0xff] }
   0x2   :  { %v25_v2 = vld [vmem:[%s451_s0] sm:$0xff]  ;;  %v292_v3 = vpack.c.bf16 %v30_v1, %v29_v0 }
   0x3   :  { %275 = vmatprep.mubr.msk.f32.mxu0 %vm31_vm0, %v25_v2 }
   0x4   :  { %12 = vsyncpa [#allocation5], 0  ;;  %293 = vmatprep.subr.bf16.mxu0 %v292_v3  ;;  %v26_v4 = vld [vmem:[%s451_s0 + $0x8] sm:$0xff]  ;;  %v27_v5 = vld [vmem:[%s451_s0 + $0x10] sm:$0xff]  ;;  %v357_v7 = vmov 0.0|0.0   ;;  %vm358_vm1 = vmmov 0  }
   0x5   :  { %295 = vmatpush3.bf16.msra.mxu0 %v292_v3  ;;  %v28_v6 = vld [vmem:[%s451_s0 + $0x18] sm:$0xff]  ;;  %296 = vmatprep.subr.bf16.mxu1 %v357_v7  ;;  %v359_v8 = vmov 0.0   ;;  %v22_v9 = vld [vmem:[%s454_s3 + $0x8] sm:$0xff]  ;;  %v21_v10 = vld [vmem:[%s454_s3] sm:$0xff]  ;;  %vm146_vm2 = vcmask 261120   ;;  %s360_s12 = smov [#allocation2]  }
   0x6   :  { %289 = vmatprep.mubr.msk.f32.mxu1 %vm358_vm1, %v359_v8  ;;  %v130_v11 = vmul.f32 0.995, %v22_v9  ;;  %v129_v13 = vmul.f32 0.995, %v21_v10  ;;  %v24_v14 = vld [vmem:[%s454_s3 + $0x18] sm:$0xff]  ;;  %v23_v17 = vld [vmem:[%s454_s3 + $0x10] sm:$0xff] }
   0x7   :  { %v132_v20 = vmul.f32 0.995, %v24_v14  ;;  %v131_v23 = vmul.f32 0.995, %v23_v17  ;;  %v141_v35 = vld [vmem:[%s452_s1] sm:$0xff]  ;;  %s230_s13 = sshll.u32 %s360_s12, 4  ;;  %s231_s13 = int_to_ptr.vmem [resolvable:$true] %s230_s13 }
   0x8   :  { %276 = vmatmul.mubr.msk.f32.vlgmr.msra.gmra.mrb[0].mxu0 %vm31_vm0, %v26_v4  ;;  %s309_s14 = scalar_lea.vmem %s231_s13, 512  ;;  %p314_p1 = scmp.lt.s32.totalorder %s231_s13, %s231_s13 }
   0x9   :  { %278 = vmatprep.mubr.msk.f32.mxu0 %vm31_vm0, %v27_v5  ;;  %p310_p0 = scmp.ne.s32.totalorder %s231_s13, %s309_s14  ;;  %p315_p2 = scmp.lt.s32.totalorder %s309_s14, %s309_s14 }
   0xb   :  { %p316_p3 = por %p315_p2, %p314_p1 }
   0xc   :  { %279 = vmatmul.mubr.msk.f32.gmra.mrb[2].mxu0 %vm31_vm0, %v28_v6 }
   0xd   :  { %p317_p4 = pnand %p316_p3, %p310_p0 }
  0xdb   :  { %v277_v12 = vpop.f32.mrb[0].mxu0 }
  0xdc   :  { %v134_v15 = vmul.f32 0.005, %v277_v12  ;;  %v110_v16 = vpop.f32.mrb[1].mxu0 }
  0xdd   :  { %v133_v18 = vmul.f32 0.005, %v110_v16 }
  0xde   :  { %v138_v19 = vadd.f32 %v134_v15, %v130_v11 }
  0xdf   :  { %v137_v21 = vadd.f32 %v133_v18, %v129_v13  ;;  %v280_v22 = vpop.f32.mrb[2].mxu0 }
  0xe0   :  { %221 = vst [vmem:[#allocation2 + $0x8] sm:$0xff] %v138_v19  ;;  %v136_v24 = vmul.f32 0.005, %v280_v22  ;;  %v120_v25 = vpop.f32.mrb[3].mxu0  ;;  %v143_v26 = vmax.f32 %v138_v19, 0.0 }
  0xe1   :  { %220 = vst [vmem:[#allocation2] sm:$0xff] %v137_v21  ;;  %v135_v27 = vmul.f32 0.005, %v120_v25  ;;  %v142_v28 = vmax.f32 %v137_v21, 0.0 }
  0xe2   :  { %v140_v29 = vadd.f32 %v136_v24, %v132_v20 }
  0xe3   :  { %v139_v30 = vadd.f32 %v135_v27, %v131_v23  ;;  %v297_v31 = vpack.c.bf16 %v143_v26, %v142_v28 }
  0xe4   :  { %v145_v32 = vmax.f32 %v140_v29, 0.0  ;;  %223 = vst [vmem:[#allocation2 + $0x18] sm:$0xff] %v140_v29 }
  0xe5   :  { %v144_v33 = vmax.f32 %v139_v30, 0.0  ;;  %222 = vst [vmem:[#allocation2 + $0x10] sm:$0xff] %v139_v30  ;;  %298 = vmatpush3.bf16.msra.mxu1 %v297_v31 }
  0xe6   :  { %299 = vmatprep.subr.bf16.mxu1 %v357_v7 }
  0xe7   :  { %v300_v34 = vpack.c.bf16 %v145_v32, %v144_v33 }
  0xe9   :  { %301 = vmatpush3.bf16.msra.mxu1 %v300_v34 }
  0xec   :  { %290 = vmatmul.mubr.msk.f32.vlgmr.msra.gmra.mrb[0].mxu1 %vm146_vm2, %v141_v35 }
  0xed   :  { %320 = shalt.err (!%p317_p4)
}
  0xee   :  { %s321_s17 = scalar_lea.hbm %s455_s4, 512 }
  0xef   :  { %p322_p5 = scmp.ne.s32.totalorder %s455_s4, %s321_s17  ;;  %p325_p6 = scmp.lt.u32.totalorder %s321_s17, %s455_s4 }
  0xf1   :  { %p327_p7 = pnand %p325_p6, %p322_p5 }
  0xf3   :  { %330 = shalt.err (!%p327_p7)
}
  0xf4   :  { %s361_s21 = smov 128   ;;  %s362_s22 = smov 8  }
  0xf5   :  { %236 = dma.vmem_to_hbm [thread:$0]  %s231_s13, 512, %s455_s4, [#allocation3], %s361_s21, %s361_s21, %s362_s22  }
  0xf6   :  { %s363_s25 = smov [#allocation4]  }
  0xf7   :  { %s243_s26 = sshll.u32 %s363_s25, 4  ;;  %s244_s26 = int_to_ptr.vmem [resolvable:$true] %s243_s26 }
  0xf8   :  { %s331_s27 = scalar_lea.vmem %s244_s26, 128  ;;  %p336_p9 = scmp.lt.s32.totalorder %s244_s26, %s244_s26 }
  0xf9   :  { %p332_p8 = scmp.ne.s32.totalorder %s244_s26, %s331_s27  ;;  %p337_p10 = scmp.lt.s32.totalorder %s331_s27, %s331_s27 }
  0xfb   :  { %p338_p11 = por %p337_p10, %p336_p9 }
  0xfd   :  { %p339_p12 = pnand %p338_p11, %p332_p8 }
 0x1bf   :  { %v216_v36 = vpop.f32.mrb[0].mxu1 }
 0x1c0   :  { %224 = vst [vmem:[#allocation4] sm:$0xff] %v216_v36  ;;  %v291_v37 = vpop.f32.mrb[1].mxu1 }
 0x1c1   :  { %342 = shalt.err (!%p339_p12)
}
 0x1c2   :  { %s343_s29 = scalar_lea.hbm %s456_s5, 128 }
 0x1c3   :  { %p344_p13 = scmp.ne.s32.totalorder %s456_s5, %s343_s29  ;;  %p347_p0 = scmp.lt.u32.totalorder %s343_s29, %s456_s5 }
 0x1c5   :  { %p349_p1 = pnand %p347_p0, %p344_p13 }
 0x1c7   :  { %352 = shalt.err (!%p349_p1)
}
 0x1c8   :  { %246 = dma.vmem_to_hbm [thread:$0]  %s244_s26, 128, %s456_s5, [#allocation5]  }
 0x1c9   :  { %353 = dma.done.wait [#allocation3], 512  }
 0x1ca   :  { %354 = vsyncadd [#allocation3], 4294966784 }
 0x1cb   :  { %355 = dma.done.wait [#allocation5], 128  }
 0x1cc   :  { %356 = vsyncadd [#allocation5], 4294967168 }
 0x1cd   :  { %253 = vsyncpa [#allocation3], 1 }
 0x1ce   :  { %254 = vsyncpa [#allocation5], 1 }

</bundles_post_ra>
